<compile_context>
chip_gen: v6e
topology: v6e:2x2x1
jax: 0.10.0
libtpu: 0.0.40
codegen_flags: <defaults>
</compile_context>

<pallas_src>
import functools

import jax
import jax.numpy as jnp
from jax.experimental import pallas as pl
from jax.experimental.pallas import tpu as pltpu


def _round_up(x: int, m: int) -> int:
    return ((x + m - 1) // m) * m


# ---------------------------------------------------------------------------
# One-off hardware probes.  The try/excepts here only guard the *queries*
# (falling back to conservative defaults); they never mask kernel compile or
# runtime errors.
# ---------------------------------------------------------------------------
@functools.lru_cache(maxsize=1)
def _chip_info():
    vmem_cap = 128 * 1024 * 1024          # v5e / v6e physical VMEM per TC
    kind = ""
    try:
        info = pltpu.get_tpu_info()
        vmem_cap = int(getattr(info, "vmem_capacity_bytes", vmem_cap))
    except Exception:                      # probe only; defaults are safe
        pass
    try:
        kind = jax.devices()[0].device_kind.lower()
    except Exception:                      # probe only; defaults are safe
        pass
    # v7x: 2 TensorCores / chip, 64 MiB VMEM per TC.  v5e/v6e: 1 TC, 128 MiB.
    num_tc = 2 if ("v7" in kind or vmem_cap <= 64 * 1024 * 1024) else 1
    return vmem_cap, num_tc, kind


def _resident_spec(block_shape):
    """BlockSpec for a weight/bias that is resident in VMEM across the whole grid.

    Constant index_map; single-buffered (pl.Buffered(1)) so resident weight VMEM
    is not doubled — this matters on v7x's 64 MiB.  The guard below only covers
    an older-JAX API mismatch at construction time (not a compile fallback).
    """
    idx = lambda i: (0, 0)
    if hasattr(pl, "Buffered"):
        try:
            return pl.BlockSpec(block_shape, idx, pipeline_mode=pl.Buffered(1))
        except TypeError:  # pl.Buffered exists but BlockSpec lacks pipeline_mode
            pass
    return pl.BlockSpec(block_shape, idx)


def _pick_tm(N, num_tc):
    """Row-tile size.

    Small N: one block per TensorCore (1 block on single-TC v5e/v6e to avoid the
    ~0.35us per-grid-step overhead; 2 equal blocks on v7x so both TCs get work).
    Large N: 512-row tiles (multiple of 256 -> v6e/v7x MXU tile, and of 128 -> v5e).
    """
    per_core = pl.cdiv(N, num_tc)
    if per_core <= 1024:
        tm = _round_up(per_core, 8)
    else:
        tm = 512
    return max(8, min(tm, _round_up(N, 8)))


def _vmem_limit(tm, in_dim, hidden, nc_pad, vmem_cap):
    """Accounting-driven vmem_limit_bytes (generation-aware cap)."""
    need = (2 * tm * in_dim * 4            # f32 feature tile, double-buffered
            + 2 * tm * nc_pad * 2          # bf16 output tile, double-buffered
            + in_dim * hidden * 2          # resident W1 (bf16, single-buffered)
            + hidden * nc_pad * 2          # resident W2 (bf16, single-buffered)
            + (hidden + nc_pad) * 4 * 2)   # biases (+slack)
    limit = max(2 * need, 32 * 1024 * 1024)        # headroom for Mosaic scratch
    limit = min(limit, (vmem_cap * 3) // 4)        # ~48 MiB v7x, ~96 MiB v5e/v6e
    return int(max(limit, need + (4 << 20)))


def _mlp_kernel(x_ref, w1_ref, b1_ref, w2_ref, b2_ref, o_ref):
    """Fused Linear -> ReLU -> Linear on one (tm, .) row tile.

    x_ref : (tm, in_dim)     f32 feature tile (cast to bf16 here, not in wrapper)
    w1_ref: (in_dim, hidden) bf16, resident across the grid
    b1_ref: (1, hidden)      f32
    w2_ref: (hidden, nc_pad) bf16, resident across the grid
    b2_ref: (1, nc_pad)      f32
    o_ref : (tm, nc_pad)     bf16 output tile (lane-dense: nc_pad % 128 == 0)
    """
    # Cast to bf16 right under the MXU (free VPU op); f32 accumulation.
    x = x_ref[...].astype(jnp.bfloat16)
    h = jnp.dot(x, w1_ref[...], preferred_element_type=jnp.float32)
    h = jnp.maximum(h + b1_ref[...], 0.0)              # bias + ReLU in f32 (VPU)
    # Keep the activation in vregs (no VMEM round-trip); bf16 feeds MXU #2.
    out = jnp.dot(h.astype(jnp.bfloat16), w2_ref[...],
                  preferred_element_type=jnp.float32)
    o_ref[...] = (out + b2_ref[...]).astype(o_ref.dtype)


def prepare_net_params(w1, b1, w2, b2):
    """One-off weight prep (hoisted out of the per-call hot path)."""
    in_dim, hidden = w1.shape
    n_cls = w2.shape[1]
    _, _, kind = _chip_info()
    # Lane-dense output: pad the class dim to a 128-lane multiple (unmasked vst);
    # if it exceeds one MXU tile, align to the native MXU N (256 on v6e/v7x).
    # TODO(synk): for n_cls << 128 at very large batch, benchmark an unpadded
    # narrow output (masked stores, 8x less write traffic) against this padding.
    mxu_n = 256 if ("v6" in kind or "v7" in kind) else 128
    nc_pad = _round_up(n_cls, 128)
    if nc_pad > 128:
        nc_pad = _round_up(nc_pad, mxu_n)

    w1_b = w1.astype(jnp.bfloat16)
    w2_b = jnp.pad(w2, ((0, 0), (0, nc_pad - n_cls))).astype(jnp.bfloat16)
    b1_f = jnp.reshape(b1, (1, hidden)).astype(jnp.float32)
    b2_f = jnp.pad(jnp.reshape(b2, (1, n_cls)),
                   ((0, 0), (0, nc_pad - n_cls))).astype(jnp.float32)
    return dict(w1=w1_b, b1=b1_f, w2=w2_b, b2=b2_f,
                in_dim=in_dim, hidden=hidden, n_cls=n_cls, nc_pad=nc_pad)


def net_forward(features, params):
    """Pallas implementation of NET.forward: output = self.net(features)."""
    N, in_dim = features.shape
    assert in_dim == params["in_dim"]
    hidden, n_cls, nc_pad = params["hidden"], params["n_cls"], params["nc_pad"]

    vmem_cap, num_tc, _ = _chip_info()
    tm = _pick_tm(N, num_tc)
    grid = (pl.cdiv(N, tm),)   # ragged last row-block is masked by Pallas:
                               # no materialized zero-row padding of x or out.

    itemsize = jnp.dtype(features.dtype).itemsize
    cost = pl.CostEstimate(
        flops=2 * N * (in_dim * hidden + hidden * nc_pad),
        transcendentals=0,
        bytes_accessed=(N * in_dim * itemsize
                        + in_dim * hidden * 2 + hidden * nc_pad * 2
                        + (hidden + nc_pad) * 4
                        + N * nc_pad * 2),
    )

    grid_spec = pltpu.PrefetchScalarGridSpec(
        num_scalar_prefetch=0,
        grid=grid,
        in_specs=[
            pl.BlockSpec((tm, in_dim), lambda i: (i, 0)),   # f32 feature row tile
            _resident_spec((in_dim, hidden)),               # W1 (bf16, resident)
            _resident_spec((1, hidden)),                    # b1 (f32)
            _resident_spec((hidden, nc_pad)),               # W2 (bf16, resident)
            _resident_spec((1, nc_pad)),                    # b2 (f32)
        ],
        out_specs=pl.BlockSpec((tm, nc_pad), lambda i: (i, 0)),
    )

    out_padded = pl.pallas_call(
        _mlp_kernel,
        out_shape=jax.ShapeDtypeStruct((N, nc_pad), jnp.bfloat16),
        grid_spec=grid_spec,
        compiler_params=pltpu.CompilerParams(
            dimension_semantics=("parallel",),   # row tiles -> both v7x TCs
            vmem_limit_bytes=_vmem_limit(tm, in_dim, hidden, nc_pad, vmem_cap),
        ),
        cost_estimate=cost,
    )(features, params["w1"], params["b1"], params["w2"], params["b2"])

    # Single fused XLA pass: class-dim slice + up-cast back to the caller dtype.
    # (Rows were never padded; nc_pad only keeps the kernel's stores lane-dense.)
    return out_padded[:, :n_cls].astype(features.dtype)


if __name__ == "__main__":
    # Small, deterministic shapes consistent with the forward pass.
    N, in_dim, hidden, n_cls = 64, 32, 64, 16

    key = jax.random.PRNGKey(0)
    k_x, k_w1, k_b1, k_w2, k_b2 = jax.random.split(key, 5)

    features = jax.random.normal(k_x, (N, in_dim), dtype=jnp.float32)
    w1 = jax.random.normal(k_w1, (in_dim, hidden), dtype=jnp.float32) * 0.1
    b1 = jax.random.normal(k_b1, (1, hidden), dtype=jnp.float32) * 0.01
    w2 = jax.random.normal(k_w2, (hidden, n_cls), dtype=jnp.float32) * 0.1
    b2 = jax.random.normal(k_b2, (1, n_cls), dtype=jnp.float32) * 0.01

    params = prepare_net_params(w1, b1, w2, b2)   # one-off weight prep (hoisted)
    out = net_forward(features, params)
    out = jax.block_until_ready(out)
    assert out.shape == (N, n_cls)
    assert out.dtype == features.dtype

    # Reference 1: same bf16-operand / f32-accumulate math as the kernel.
    x16 = features.astype(jnp.bfloat16)
    h_ref = jnp.maximum(
        jnp.dot(x16, w1.astype(jnp.bfloat16),
                preferred_element_type=jnp.float32) + b1, 0.0)
    ref_bf16 = jnp.dot(h_ref.astype(jnp.bfloat16), w2.astype(jnp.bfloat16),
                       preferred_element_type=jnp.float32) + b2
    assert jnp.allclose(out, ref_bf16, atol=1e-2, rtol=1e-2)

    # Reference 2: pure f32 math, loose tolerance (bf16 operand/output rounding).
    ref_f32 = jnp.maximum(features @ w1 + b1, 0.0) @ w2 + b2
    assert jnp.allclose(out, ref_f32, atol=6e-2, rtol=6e-2)

    # TODO(synk): observe_task_IL (Adam step, CE loss, graph condensation) is
    # host-side training logic, not part of forward; intentionally not kernelized.
    print("KERNEL_OK")
</pallas_src>

<mosaic_0001>
module attributes {stable_mosaic.version = 11 : i64} {
  func.func @_mlp_kernel(%arg0: i32, %arg1: memref<64x32xf32, #tpu.memory_space<vmem>>, %arg2: memref<32x64xbf16, #tpu.memory_space<vmem>>, %arg3: memref<1x64xf32, #tpu.memory_space<vmem>>, %arg4: memref<64x128xbf16, #tpu.memory_space<vmem>>, %arg5: memref<1x128xf32, #tpu.memory_space<vmem>>, %arg6: memref<64x128xbf16, #tpu.memory_space<vmem>>) attributes {dimension_semantics = [#tpu.dimension_semantics<parallel>], iteration_bounds = array<i64: 1>, scalar_prefetch = 0 : i64, scratch_operands = 0 : i64, tpu.core_type = #tpu.core_type<tc>, window_params = [{transform_indices = @transform_0, window_bounds = array<i64: 64, 32>}, {pipeline_mode = #tpu.pipeline_mode<synchronous>, transform_indices = @transform_1, window_bounds = array<i64: 32, 64>}, {pipeline_mode = #tpu.pipeline_mode<synchronous>, transform_indices = @transform_2, window_bounds = array<i64: 1, 64>}, {pipeline_mode = #tpu.pipeline_mode<synchronous>, transform_indices = @transform_3, window_bounds = array<i64: 64, 128>}, {pipeline_mode = #tpu.pipeline_mode<synchronous>, transform_indices = @transform_4, window_bounds = array<i64: 1, 128>}, {transform_indices = @transform_5, window_bounds = array<i64: 64, 128>}]} {
    %c0 = arith.constant 0 : index
    %c0_0 = arith.constant 0 : index
    %0 = vector.load %arg1[%c0, %c0_0] : memref<64x32xf32, #tpu.memory_space<vmem>>, vector<64x32xf32>
    %1 = arith.truncf %0 : vector<64x32xf32> to vector<64x32xbf16>
    %c0_1 = arith.constant 0 : index
    %c0_2 = arith.constant 0 : index
    %2 = vector.load %arg2[%c0_1, %c0_2] : memref<32x64xbf16, #tpu.memory_space<vmem>>, vector<32x64xbf16>
    %cst = arith.constant dense<0.000000e+00> : vector<64x64xf32>
    %3 = tpu.matmul %1, %2, %cst {dimension_numbers = #tpu.dot_dimension_numbers<[1], [0], [0], [1], [0, 0, 1, 1], [], []>} : vector<64x32xbf16>, vector<32x64xbf16>, vector<64x64xf32> -> vector<64x64xf32>
    %c0_3 = arith.constant 0 : index
    %c0_4 = arith.constant 0 : index
    %4 = vector.load %arg3[%c0_3, %c0_4] : memref<1x64xf32, #tpu.memory_space<vmem>>, vector<1x64xf32>
    %5 = vector.broadcast %4 : vector<1x64xf32> to vector<64x64xf32>
    %6 = arith.addf %3, %5 : vector<64x64xf32>
    %cst_5 = arith.constant 0.000000e+00 : f32
    %7 = vector.broadcast %cst_5 : f32 to vector<64x64xf32>
    %8 = arith.maximumf %6, %7 : vector<64x64xf32>
    %9 = arith.truncf %8 : vector<64x64xf32> to vector<64x64xbf16>
    %c0_6 = arith.constant 0 : index
    %c0_7 = arith.constant 0 : index
    %10 = vector.load %arg4[%c0_6, %c0_7] : memref<64x128xbf16, #tpu.memory_space<vmem>>, vector<64x128xbf16>
    %cst_8 = arith.constant dense<0.000000e+00> : vector<64x128xf32>
    %11 = tpu.matmul %9, %10, %cst_8 {dimension_numbers = #tpu.dot_dimension_numbers<[1], [0], [0], [1], [0, 0, 1, 1], [], []>} : vector<64x64xbf16>, vector<64x128xbf16>, vector<64x128xf32> -> vector<64x128xf32>
    %c0_9 = arith.constant 0 : index
    %c0_10 = arith.constant 0 : index
    %12 = vector.load %arg5[%c0_9, %c0_10] : memref<1x128xf32, #tpu.memory_space<vmem>>, vector<1x128xf32>
    %13 = vector.broadcast %12 : vector<1x128xf32> to vector<64x128xf32>
    %14 = arith.addf %11, %13 : vector<64x128xf32>
    %15 = arith.truncf %14 : vector<64x128xf32> to vector<64x128xbf16>
    %c0_11 = arith.constant 0 : index
    %c0_12 = arith.constant 0 : index
    %16 = vector.load %arg6[%c0_11, %c0_12] : memref<64x128xbf16, #tpu.memory_space<vmem>>, vector<64x128xbf16>
    tpu.vector_store %arg6[%c0_11, %c0_12], %15 {strides = array<i32>} : memref<64x128xbf16, #tpu.memory_space<vmem>>, vector<64x128xbf16>,
    return
  }
  func.func @transform_0(%arg0: i32) -> (i32, i32) {
    %c0_i32 = arith.constant 0 : i32
    %c0_i32_0 = arith.constant 0 : i32
    return %arg0, %c0_i32 : i32, i32
  }
  func.func @transform_1(%arg0: i32) -> (i32, i32) {
    %c0_i32 = arith.constant 0 : i32
    %c0_i32_0 = arith.constant 0 : i32
    %c0_i32_1 = arith.constant 0 : i32
    return %c0_i32, %c0_i32_0 : i32, i32
  }
  func.func @transform_2(%arg0: i32) -> (i32, i32) {
    %c0_i32 = arith.constant 0 : i32
    %c0_i32_0 = arith.constant 0 : i32
    %c0_i32_1 = arith.constant 0 : i32
    return %c0_i32, %c0_i32_0 : i32, i32
  }
  func.func @transform_3(%arg0: i32) -> (i32, i32) {
    %c0_i32 = arith.constant 0 : i32
    %c0_i32_0 = arith.constant 0 : i32
    %c0_i32_1 = arith.constant 0 : i32
    return %c0_i32, %c0_i32_0 : i32, i32
  }
  func.func @transform_4(%arg0: i32) -> (i32, i32) {
    %c0_i32 = arith.constant 0 : i32
    %c0_i32_0 = arith.constant 0 : i32
    %c0_i32_1 = arith.constant 0 : i32
    return %c0_i32, %c0_i32_0 : i32, i32
  }
  func.func @transform_5(%arg0: i32) -> (i32, i32) {
    %c0_i32 = arith.constant 0 : i32
    %c0_i32_0 = arith.constant 0 : i32
    return %arg0, %c0_i32 : i32, i32
  }
}

</mosaic_0001>

<bundles_post_ra>
// kernel: tpu_custom_call.1
= control target key start
LH: loop header
LB: loop body
LE: loop exit
PB: predicated region body
PF: predicated region fallthrough
CT: control target
= control target key end

     0   :  { %vm57_vm0 = vcmask 261120   ;;  %s540_s0 = inlined_call_operand.vmem [shape: f32[64,32], index: 0, kind: input, shape index: {}]   ;;  %s541_s1 = inlined_call_operand.vmem [shape: bf16[32,64], index: 1, kind: input, shape index: {}]   ;;  %s542_s2 = inlined_call_operand.vmem [shape: f32[1,64], index: 2, kind: input, shape index: {}]   ;;  %s543_s3 = inlined_call_operand.vmem [shape: bf16[64,128], index: 3, kind: input, shape index: {}]   ;;  %s544_s4 = inlined_call_operand.vmem [shape: f32[1,128], index: 4, kind: input, shape index: {}]   ;;  %s545_s5 = inlined_call_operand.hbm [shape: bf16[64,128], index: 5, kind: output, shape index: {}]  }
   0x1   :  { %v420_v0 = vld [vmem:[%s541_s1 + $0x8] sm:$0xff]   ;;  %v421_v1 = vld [vmem:[%s541_s1] sm:$0xff]   ;;  %v24_v5 = vld [vmem:[%s540_s0 + $0x10] sm:$0xff] }
   0x2   :  { %389 = vmatprep.subr.bf16.mxu0 %v420_v0  ;;  %v22_v2 = vld [vmem:[%s540_s0] sm:$0xff]  ;;  %v23_v3 = vld [vmem:[%s540_s0 + $0x8] sm:$0xff]  ;;  %v25_v6 = vld [vmem:[%s540_s0 + $0x18] sm:$0xff] }
   0x3   :  { %390 = vmatpush3.bf16.msra.mxu0 %v420_v0  ;;  %v30_v4 = vpack.c.bf16 %v23_v3, %v22_v2  ;;  %v26_v7 = vld [vmem:[%s540_s0 + $0x20] sm:$0xff]  ;;  %v27_v8 = vld [vmem:[%s540_s0 + $0x28] sm:$0xff]  ;;  %v422_v9 = vld [vmem:[%s543_s3 + $0x18] sm:$0xff]   ;;  %v31_v10 = vpack.c.bf16 %v25_v6, %v24_v5 }
   0x4   :  { %391 = vmatprep.subr.bf16.mxu0 %v421_v1  ;;  %v32_v11 = vpack.c.bf16 %v27_v8, %v26_v7  ;;  %401 = vmatprep.subr.bf16.mxu1 %v422_v9 }
   0x5   :  { %393 = vmatprep.mubr.msk.bf16.mxu0 %vm57_vm0, %v30_v4 }
   0x7   :  { %392 = vmatpush3.bf16.msra.mxu0 %v421_v1 }
   0x8   :  { %10 = vsyncpa [#allocation3], 0  ;;  %402 = vmatpush3.bf16.msra.mxu1 %v422_v9  ;;  %v28_v12 = vld [vmem:[%s540_s0 + $0x30] sm:$0xff]  ;;  %v29_v13 = vld [vmem:[%s540_s0 + $0x38] sm:$0xff]  ;;  %vm186_vm1 = vcmask 523264   ;;  %s448_s21 = smov [#allocation2]  }
   0x9   :  { %v33_v14 = vpack.c.bf16 %v29_v13, %v28_v12  ;;  %v423_v15 = vld [vmem:[%s543_s3 + $0x10] sm:$0xff]   ;;  %v424_v16 = vld [vmem:[%s543_s3 + $0x8] sm:$0xff]   ;;  %v425_v17 = vld [vmem:[%s543_s3] sm:$0xff]   ;;  %s309_s22 = sshll.u32 %s448_s21, 4  ;;  %s310_s22 = int_to_ptr.vmem [resolvable:$true] %s309_s22 }
   0xa   :  { %394 = vmatmul.mubr.msk.bf16.vlgmr.msra.gmra.mxu0 %vm57_vm0, %v31_v10  ;;  %403 = vmatprep.subr.bf16.mxu1 %v423_v15  ;;  %v320_v20 = vld [vmem:[%s542_s2] ss:$0 sm:$0xff]  ;;  %p431_p1 = scmp.lt.s32.totalorder %s310_s22, %s310_s22 }
   0xb   :  { %397 = vmatprep.mubr.msk.bf16.mxu0 %vm57_vm0, %v32_v11  ;;  %v327_v48 = vld [vmem:[%s544_s4] ss:$0 sm:$0xff]  ;;  %s426_s4 = scalar_lea.vmem %s310_s22, 512 }
   0xc   :  { %404 = vmatpush3.bf16.msra.mxu1 %v423_v15  ;;  %p427_p0 = scmp.ne.s32.totalorder %s310_s22, %s426_s4  ;;  %p432_p2 = scmp.lt.s32.totalorder %s426_s4, %s426_s4 }
   0xd   :  { %405 = vmatprep.subr.bf16.mxu1 %v424_v16 }
   0xe   :  { %p433_p3 = por %p432_p2, %p431_p1 }
  0x10   :  { %406 = vmatpush3.bf16.msra.mxu1 %v424_v16  ;;  %p434_p4 = pnand %p433_p3, %p427_p0 }
  0x11   :  { %407 = vmatprep.subr.bf16.mxu1 %v425_v17 }
  0x12   :  { %398 = vmatmul.mubr.msk.bf16.gmra.mxu0 %vm57_vm0, %v33_v14 }
  0x14   :  { %408 = vmatpush3.bf16.msra.mxu1 %v425_v17 }
  0xca   :  { %v395_v18 = vpop.f32.mrf.mxu0 }
  0xcb   :  { %v113_v24 = vadd.f32 %v395_v18, %v320_v20 }
  0xcc   :  { %v104_v19 = vpop.f32.mrf.mxu0 }
  0xcd   :  { %v105_v22 = vadd.f32 %v320_v20, %v104_v19  ;;  %v137_v31 = vmax.f32 %v113_v24, 0.0 }
  0xce   :  { %v396_v21 = vpop.f32.mrf.mxu0 }
  0xcf   :  { %v116_v23 = vadd.f32 %v396_v21, %v320_v20  ;;  %v135_v29 = vmax.f32 %v105_v22, 0.0 }
  0xd0   :  { %v107_v25 = vpop.f32.mrf.mxu0 }
  0xd1   :  { %v108_v26 = vadd.f32 %v320_v20, %v107_v25  ;;  %v138_v27 = vmax.f32 %v116_v23, 0.0 }
  0xd2   :  { %v399_v28 = vpop.f32.mrf.mxu0 }
  0xd3   :  { %v136_v30 = vmax.f32 %v108_v26, 0.0  ;;  %v144_v34 = vpack.c.bf16 %v138_v27, %v137_v31  ;;  %v129_v38 = vadd.f32 %v399_v28, %v320_v20 }
  0xd4   :  { %v120_v32 = vpop.f32.mrf.mxu0 }
  0xd5   :  { %v143_v33 = vpack.c.bf16 %v136_v30, %v135_v29  ;;  %v121_v36 = vadd.f32 %v320_v20, %v120_v32  ;;  %v141_v44 = vmax.f32 %v129_v38, 0.0 }
  0xd6   :  { %v400_v35 = vpop.f32.mrf.mxu0 }
  0xd7   :  { %v132_v37 = vadd.f32 %v400_v35, %v320_v20  ;;  %409 = vmatprep.mubr.msk.bf16.mxu1 %vm186_vm1, %v143_v33  ;;  %v139_v42 = vmax.f32 %v121_v36, 0.0 }
  0xd8   :  { %v123_v39 = vpop.f32.mrf.mxu0  ;;  %410 = vmatmul.mubr.msk.bf16.vlgmr.msra.gmra.mxu1 %vm186_vm1, %v144_v34 }
  0xd9   :  { %v124_v40 = vadd.f32 %v320_v20, %v123_v39  ;;  %v142_v41 = vmax.f32 %v132_v37, 0.0 }
  0xdb   :  { %v140_v43 = vmax.f32 %v124_v40, 0.0  ;;  %v146_v46 = vpack.c.bf16 %v142_v41, %v141_v44 }
  0xdd   :  { %v145_v45 = vpack.c.bf16 %v140_v43, %v139_v42 }
  0xdf   :  { %413 = vmatprep.mubr.msk.bf16.mxu1 %vm186_vm1, %v145_v45 }
  0xe0   :  { %414 = vmatmul.mubr.msk.bf16.gmra.mxu1 %vm186_vm1, %v146_v46 }
 0x198   :  { %v411_v47 = vpop.f32.mrf.mxu1 }
 0x199   :  { %v242_v51 = vadd.f32 %v411_v47, %v327_v48 }
 0x19a   :  { %v233_v49 = vpop.f32.mrf.mxu1 }
 0x19b   :  { %v234_v54 = vadd.f32 %v327_v48, %v233_v49 }
 0x19c   :  { %v412_v50 = vpop.f32.mrf.mxu1 }
 0x19d   :  { %v245_v52 = vadd.f32 %v412_v50, %v327_v48 }
 0x19e   :  { %v236_v53 = vpop.f32.mrf.mxu1 }
 0x19f   :  { %v360_v55 = vpack.c.bf16 %v245_v52, %v242_v51  ;;  %v237_v56 = vadd.f32 %v327_v48, %v236_v53 }
 0x1a0   :  { %v415_v57 = vpop.f32.mrf.mxu1 }
 0x1a1   :  { %372 = vst [vmem:[#allocation2 + $0x8] sm:$0xff] %v360_v55   ;;  %v355_v58 = vpack.c.bf16 %v237_v56, %v234_v54  ;;  %v258_v61 = vadd.f32 %v415_v57, %v327_v48 }
 0x1a2   :  { %v249_v59 = vpop.f32.mrf.mxu1 }
 0x1a3   :  { %356 = vst [vmem:[#allocation2] sm:$0xff] %v355_v58   ;;  %v250_v0 = vadd.f32 %v327_v48, %v249_v59 }
 0x1a4   :  { %v416_v60 = vpop.f32.mrf.mxu1 }
 0x1a5   :  { %v261_v62 = vadd.f32 %v416_v60, %v327_v48 }
 0x1a6   :  { %v252_v63 = vpop.f32.mrf.mxu1 }
 0x1a7   :  { %v370_v1 = vpack.c.bf16 %v261_v62, %v258_v61  ;;  %v253_v2 = vadd.f32 %v327_v48, %v252_v63 }
 0x1a9   :  { %374 = vst [vmem:[#allocation2 + $0x18] sm:$0xff] %v370_v1   ;;  %v365_v3 = vpack.c.bf16 %v253_v2, %v250_v0 }
 0x1ab   :  { %373 = vst [vmem:[#allocation2 + $0x10] sm:$0xff] %v365_v3  }
 0x1ac   :  { %437 = shalt.err (!%p434_p4)
}
 0x1ad   :  { %s449_s23 = smov 64   ;;  %s450_s24 = smov 4  }
 0x1ae   :  { %315 = dma.vmem_to_hbm [thread:$0]  %s310_s22, 512, %s545_s5, [#allocation3], %s449_s23, %s449_s23, %s450_s24  }
 0x1af   :  { %446 = dma.done.wait [#allocation3], 512  }
 0x1b0   :  { %447 = vsyncadd [#allocation3], 4294966784 }
 0x1b1   :  { %319 = vsyncpa [#allocation3], 1 }

</bundles_post_ra>
